<compile_context>
chip_gen: v7x
topology: tpu7x:2x2x1
jax: 0.10.0
libtpu: 0.0.40
codegen_flags: <defaults>
</compile_context>

<pallas_src>
import functools

import numpy as np
import jax
import jax.numpy as jnp
from jax.experimental import pallas as pl
from jax.experimental.pallas import tpu as pltpu

EPS = 1e-5


def _sigmoid(z):
    # exact sigmoid: exp on the EUP slot, tiny VPU divide (gates stay accurate)
    return 1.0 / (1.0 + jnp.exp(-z))


# ---------------------------------------------------------------------------
# pltpu.roll shift-convention probe (run once, eagerly, outside jit).
# ---------------------------------------------------------------------------
_ROLL_IS_NUMPY_CONVENTION = True   # refined by detect_roll_convention()


def detect_roll_convention():
    """Empirically check whether pltpu.roll follows np.roll's shift sign."""
    global _ROLL_IS_NUMPY_CONVENTION

    def k(x_ref, o_ref):
        o_ref[...] = pltpu.roll(x_ref[...], 1, axis=1)

    x = jnp.broadcast_to(jnp.arange(256, dtype=jnp.float32)[None, :], (8, 256))
    y = pl.pallas_call(k, out_shape=jax.ShapeDtypeStruct((8, 256), jnp.float32))(x)
    # np.roll convention: result[:, 1] == x[:, 0] == 0
    _ROLL_IS_NUMPY_CONVENTION = bool(jax.device_get(y)[0, 1] == 0.0)
    return _ROLL_IS_NUMPY_CONVENTION


# ---------------------------------------------------------------------------
# Fused kernel: inception branches + CBAM, one batch element per grid step.
# ---------------------------------------------------------------------------
def _fused_kernel(
    x_ref,
    m27_ref,                       # (27, M) tap-validity masks (constant)
    w1_ref, t1_ref,                # branch1: 1x1x1 conv (BN folded) + shift
    w2a_ref, t2a_ref,              # branch2: 1x1x1
    w2b_ref, t2b_ref,              # branch2: 3x3x3 (im2col-folded weights)
    w3a_ref, t3a_ref,              # branch3: 1x1x1
    w3b_ref, t3b_ref,              # branch3: 3x3x3
    w4_ref, t4_ref,                # branch4: 1x1x1 after maxpool
    caw1_ref, caw2_ref,            # CBAM channel-attention MLP (no bias)
    saA_ref, sab_ref,              # CBAM spatial attention: (2M, M) Toeplitz + bias
    o_ref,
    im2col_ref,                    # VMEM scratch (27*max(c2,c3), M), reused
    *, D, H, W, c2, c3, roll_np,
):
    f32 = jnp.float32
    HW = H * W
    M = D * HW

    x = x_ref[0]                                       # (Cin, M)

    def tap_shift(v, dd, dh, dw):
        # u[:, (d,h,w)] = v[:, (d+dd, h+dh, w+dw)], out-of-range -> 0
        off = dd * HW + dh * W + dw
        if off == 0:
            return v
        amt = (-off) % M if roll_np else off % M
        u = pltpu.roll(v, amt, axis=1) if amt else v   # XLU lane rotate
        tap = (dd + 1) * 9 + (dh + 1) * 3 + (dw + 1)
        return u * m27_ref[tap:tap + 1, :]             # precomputed 0/1 mask

    def pointwise(v, w_r, t_r):
        y = jnp.dot(w_r[...], v, preferred_element_type=f32)
        return jnp.maximum(y + t_r[...], 0.0)

    def conv3x3x3(v, w_r, t_r, cin):
        # in-VMEM im2col: 27 rolled+masked slabs stored to a reused scratch,
        # consumed by one K = 27*cin MXU dot.
        for dd in (-1, 0, 1):
            for dh in (-1, 0, 1):
                for dw in (-1, 0, 1):
                    tap = (dd + 1) * 9 + (dh + 1) * 3 + (dw + 1)
                    im2col_ref[tap * cin:(tap + 1) * cin, :] = tap_shift(v, dd, dh, dw)
        y = jnp.dot(w_r[...], im2col_ref[0:27 * cin, :], preferred_element_type=f32)
        return jnp.maximum(y + t_r[...], 0.0)

    def maxpool3x3x3(v):
        # separable 3-tap max == MaxPool3d(3, stride=1, padding=1);
        # v >= 0 (post-ReLU) so the masked 0-fill never beats the centre tap.
        for dd, dh, dw in ((0, 0, 1), (0, 1, 0), (1, 0, 0)):
            v = jnp.maximum(jnp.maximum(tap_shift(v, dd, dh, dw),
                                        tap_shift(v, -dd, -dh, -dw)), v)
        return v

    # ---- inception branches (chained, exactly as in the reference) ---------
    x1 = pointwise(x, w1_ref, t1_ref)
    x2 = conv3x3x3(pointwise(x1, w2a_ref, t2a_ref), w2b_ref, t2b_ref, c2)
    x3 = conv3x3x3(pointwise(x2, w3a_ref, t3a_ref), w3b_ref, t3b_ref, c3)
    x4 = pointwise(maxpool3x3x3(x3), w4_ref, t4_ref)
    xc = jnp.concatenate([x1, x2, x3, x4], axis=0)      # (nc, M)

    # ---- CBAM channel attention (avg-pool descriptor only, as in reference)
    avg = jnp.mean(xc, axis=1, keepdims=True)           # (nc, 1)
    hmid = jnp.maximum(
        jnp.dot(caw1_ref[...], avg, preferred_element_type=f32), 0.0)
    ca = _sigmoid(jnp.dot(caw2_ref[...], hmid, preferred_element_type=f32))
    y1 = xc * ca                                        # channel-attended

    # ---- CBAM spatial attention: 7x7x7 conv on [max; min] channel maps,
    #      realised as one lane-dense (1, 2M) x (2M, M) Toeplitz matmul.
    mx = jnp.max(y1, axis=0, keepdims=True)             # (1, M)
    mn = jnp.min(y1, axis=0, keepdims=True)             # (1, M)
    v2 = jnp.concatenate([mx, mn], axis=1)              # (1, 2M)
    s = jnp.dot(v2, saA_ref[...], preferred_element_type=f32)   # (1, M)
    sa = _sigmoid(s + sab_ref[0, 0])                    # bias scalar from SMEM

    # CBAM wrapper semantics: out = x * spatial(channel(x)) = xc * (y1 * sa)
    o_ref[0] = xc * (y1 * sa)


# ---------------------------------------------------------------------------
# Parameter construction: conv weights reshaped for the kernel, BN folded into
# the weights, spatial-attention 7x7x7 conv expanded into a (2M, M) Toeplitz.
# ---------------------------------------------------------------------------
def init_conv_bn(key, cin, cout, k):
    ks = jax.random.split(key, 6)
    w = 0.2 * jax.random.normal(ks[0], (k, k, k, cin, cout), jnp.float32)
    b = 0.1 * jax.random.normal(ks[1], (cout,), jnp.float32)
    gamma = 1.0 + 0.1 * jax.random.normal(ks[2], (cout,), jnp.float32)
    beta = 0.1 * jax.random.normal(ks[3], (cout,), jnp.float32)
    mean = 0.1 * jax.random.normal(ks[4], (cout,), jnp.float32)
    var = 1.0 + 0.1 * jnp.abs(jax.random.normal(ks[5], (cout,), jnp.float32))
    s = gamma / jnp.sqrt(var + EPS)                       # BN scale
    shift = ((b - mean) * s + beta).reshape(cout, 1)
    if k == 1:
        wk = w.reshape(cin, cout).T                       # (cout, cin)
    else:
        # tap-major (kd,kh,kw) then cin, matching the kernel's im2col order
        wk = jnp.transpose(w, (4, 0, 1, 2, 3)).reshape(cout, k * k * k * cin)
    wk = wk * s[:, None]                                  # fold BN scale in
    return {"w": wk, "shift": shift}


def _build_sa_full(sa_w, D, H, W):
    # sa_w: (2, 7, 7, 7) == Conv3d(2 -> 1, k=7, pad=3) weight (out-ch squeezed)
    # A[c*M + m_in, m_out] = sa_w[c, d_in-d_out+3, h_in-h_out+3, w_in-w_out+3]
    HW = H * W
    M = D * HW
    m = jnp.arange(M)
    d, h, w = m // HW, (m // W) % H, m % W
    kd = d[:, None] - d[None, :] + 3
    kh = h[:, None] - h[None, :] + 3
    kw = w[:, None] - w[None, :] + 3
    valid = (kd >= 0) & (kd < 7) & (kh >= 0) & (kh < 7) & (kw >= 0) & (kw < 7)
    A = sa_w[:, jnp.clip(kd, 0, 6), jnp.clip(kh, 0, 6), jnp.clip(kw, 0, 6)]
    A = jnp.where(valid[None], A, 0.0)                    # (2, M, M)
    return A.reshape(2 * M, M)


def _build_tap_masks(D, H, W):
    # (27, M) validity masks, tap index = (dd+1)*9 + (dh+1)*3 + (dw+1)
    HW = H * W
    M = D * HW
    m = np.arange(M)
    d, h, w = m // HW, (m // W) % H, m % W
    masks = np.zeros((27, M), np.float32)
    for dd in (-1, 0, 1):
        for dh in (-1, 0, 1):
            for dw in (-1, 0, 1):
                tap = (dd + 1) * 9 + (dh + 1) * 3 + (dw + 1)
                ok = ((d + dd >= 0) & (d + dd < D) & (h + dh >= 0) & (h + dh < H)
                      & (w + dw >= 0) & (w + dw < W))
                masks[tap] = ok.astype(np.float32)
    return jnp.asarray(masks)


def init_params(key, in_channels, ocs, D, H, W):
    ks = jax.random.split(key, 10)
    nc = ocs[0] + ocs[2] + ocs[4] + ocs[5]
    ncr = max(nc // 16, 1)
    sa_w = 0.05 * jax.random.normal(ks[8], (2, 7, 7, 7), jnp.float32)
    return {
        "b1": init_conv_bn(ks[0], in_channels, ocs[0], 1),
        "b2a": init_conv_bn(ks[1], ocs[0], ocs[1], 1),
        "b2b": init_conv_bn(ks[2], ocs[1], ocs[2], 3),
        "b3a": init_conv_bn(ks[3], ocs[2], ocs[3], 1),
        "b3b": init_conv_bn(ks[4], ocs[3], ocs[4], 3),
        "b4": init_conv_bn(ks[5], ocs[4], ocs[5], 1),
        # CBAM channel attention (Conv3d 1x1, bias=False)
        "ca_w1": 0.2 * jax.random.normal(ks[6], (ncr, nc), jnp.float32),
        "ca_w2": 0.2 * jax.random.normal(ks[7], (nc, ncr), jnp.float32),
        # CBAM spatial attention Conv3d(2 -> 1, k=7, pad=3, bias=True)
        "sa_A": _build_sa_full(sa_w, D, H, W),            # (2*M, M)
        "sa_b": 0.1 * jax.random.normal(ks[9], (1, 1), jnp.float32),
    }


# ---------------------------------------------------------------------------
# Forward pass: a single pallas_call over the batch.
# ---------------------------------------------------------------------------
def inception_cbam_forward(x, params):
    # x: (N, Cin, D, H, W)  (NCDHW, like the PyTorch reference)
    N, Cin, D, H, W = x.shape
    M = D * H * W
    p = params
    nc = p["ca_w2"].shape[0]
    c2 = p["b2b"]["w"].shape[1] // 27
    c3 = p["b3b"]["w"].shape[1] // 27

    mask27 = _build_tap_masks(D, H, W)                    # constant (27, M)

    vmem_consts = [
        mask27,
        p["b1"]["w"], p["b1"]["shift"],
        p["b2a"]["w"], p["b2a"]["shift"],
        p["b2b"]["w"], p["b2b"]["shift"],
        p["b3a"]["w"], p["b3a"]["shift"],
        p["b3b"]["w"], p["b3b"]["shift"],
        p["b4"]["w"], p["b4"]["shift"],
        p["ca_w1"], p["ca_w2"],
        p["sa_A"],
    ]

    def _const_spec(a):
        nd = a.ndim
        return pl.BlockSpec(a.shape, lambda n, _nd=nd: (0,) * _nd)

    in_specs = [pl.BlockSpec((1, Cin, M), lambda n: (n, 0, 0))]
    in_specs += [_const_spec(a) for a in vmem_consts]
    in_specs += [pl.BlockSpec(memory_space=pltpu.MemorySpace.SMEM)]   # sa_b

    out = pl.pallas_call(
        functools.partial(_fused_kernel, D=D, H=H, W=W, c2=c2, c3=c3,
                          roll_np=_ROLL_IS_NUMPY_CONVENTION),
        out_shape=jax.ShapeDtypeStruct((N, nc, M), jnp.float32),
        grid=(N,),
        in_specs=in_specs,
        out_specs=pl.BlockSpec((1, nc, M), lambda n: (n, 0, 0)),
        scratch_shapes=[pltpu.VMEM((27 * max(c2, c3), M), jnp.float32)],
        compiler_params=pltpu.CompilerParams(
            dimension_semantics=("parallel",),
            vmem_limit_bytes=32 * 1024 * 1024,
        ),
    )(x.reshape(N, Cin, M), *vmem_consts, p["sa_b"])

    return out.reshape(N, nc, D, H, W)


if __name__ == "__main__":
    N, Cin, D, H, W = 2, 4, 8, 8, 8
    out_channels = [8, 8, 8, 8, 8, 8]     # nc = 8+8+8+8 = 32, reduction 16 -> 2

    # Resolve the pltpu.roll shift convention once (eagerly, outside jit).
    detect_roll_convention()

    key = jax.random.PRNGKey(0)
    kx, kp = jax.random.split(key)
    x = jax.random.normal(kx, (N, Cin, D, H, W), jnp.float32)   # NCDHW
    params = init_params(kp, Cin, out_channels, D, H, W)

    out = jax.jit(inception_cbam_forward)(x, params)
    out = jax.block_until_ready(out)
    assert out.shape == (N, 32, D, H, W)
    assert bool(jnp.all(jnp.isfinite(out)))
    print("KERNEL_OK")
</pallas_src>

<mosaic_0001>
module attributes {stable_mosaic.version = 11 : i64} {
  func.func @k(%arg0: memref<8x256xf32, #tpu.memory_space<vmem>>, %arg1: memref<8x256xf32, #tpu.memory_space<vmem>>) attributes {dimension_semantics = [], scalar_prefetch = 0 : i64, scratch_operands = 0 : i64, tpu.core_type = #tpu.core_type<tc>} {
    %c0 = arith.constant 0 : index
    %c0_0 = arith.constant 0 : index
    %0 = vector.load %arg0[%c0, %c0_0] : memref<8x256xf32, #tpu.memory_space<vmem>>, vector<8x256xf32>
    %c1_i32 = arith.constant 1 : i32
    %1 = tpu.dynamic_rotate %0 by %c1_i32 dim 1 : vector<8x256xf32>, i32 -> vector<8x256xf32>
    %c0_1 = arith.constant 0 : index
    %c0_2 = arith.constant 0 : index
    %2 = vector.load %arg1[%c0_1, %c0_2] : memref<8x256xf32, #tpu.memory_space<vmem>>, vector<8x256xf32>
    tpu.vector_store %arg1[%c0_1, %c0_2], %1 {strides = array<i32>} : memref<8x256xf32, #tpu.memory_space<vmem>>, vector<8x256xf32>,
    return
  }
}

</mosaic_0001>

<bundles_post_ra>
// kernel: tpu_custom_call.1
= control target key start
LH: loop header
LB: loop body
LE: loop exit
PB: predicated region body
PF: predicated region fallthrough
CT: control target
= control target key end

     0   :  { %6 = vsyncpa [#allocation3], 0  ;;  %s137_s0 = inlined_call_operand.hbm [shape: f32[8,256], index: 0, kind: input, shape index: {}]   ;;  %s138_s1 = inlined_call_operand.hbm [shape: f32[8,256], index: 1, kind: output, shape index: {}]  }
   0x1   :  { %7 = vsyncpa [#allocation4], 0  ;;  %s100_s6 = smov [#allocation2]   ;;  %s52_s10 = scalar_lea.hbm %s137_s0, 256 }
   0x2   :  { %s14_s7 = sshll.u32 %s100_s6, 4  ;;  %p53_p0 = scmp.ne.s32.totalorder %s137_s0, %s52_s10  ;;  %s15_s7 = int_to_ptr.vmem [resolvable:$true] %s14_s7 }
   0x3   :  { %p56_p1 = scmp.lt.u32.totalorder %s52_s10, %s137_s0 }
   0x5   :  { %p58_p2 = pnand %p56_p1, %p53_p0 }
   0x7   :  { %61 = shalt.err (!%p58_p2)
}
   0x8   :  { %s62_s15 = scalar_lea.vmem %s15_s7, 256  ;;  %p67_p4 = scmp.lt.s32.totalorder %s15_s7, %s15_s7 }
   0x9   :  { %p63_p3 = scmp.ne.s32.totalorder %s15_s7, %s62_s15  ;;  %p68_p5 = scmp.lt.s32.totalorder %s62_s15, %s62_s15 }
   0xb   :  { %p69_p6 = por %p68_p5, %p67_p4 }
   0xd   :  { %p70_p7 = pnand %p69_p6, %p63_p3 }
   0xf   :  { %73 = shalt.err (!%p70_p7)
}
  0x10   :  { %17 = dma.hbm_to_vmem [thread:$0]  %s137_s0, 256, %s15_s7, [#allocation3]  }
  0x11   :  { %96 = dma.done.wait [#allocation3], 256  }
  0x12   :  { %97 = vsyncadd [#allocation3], 4294967040  ;;  %v21_v0 = vld [vmem:[#allocation2] sm:$0xff]  ;;  %s101_s18 = smov 1   ;;  %v22_v1 = vld [vmem:[#allocation2 + $0x8] sm:$0xff]  ;;  %v27_v2 = vlaneseq  ;;  %s102_s19 = smov [#allocation5]  }
  0x13   :  { %23 = vrot.lane.b32.xlu0 %v21_v0, %s101_s18  ;;  %s40_s20 = sshll.u32 %s102_s19, 4  ;;  %s41_s20 = int_to_ptr.vmem [resolvable:$true] %s40_s20 }
  0x14   :  { %v28_v3 = vand.u32 127, %v27_v2  ;;  %s74_s0 = scalar_lea.vmem %s41_s20, 256  ;;  %p79_p9 = scmp.lt.s32.totalorder %s41_s20, %s41_s20 }
  0x15   :  { %p75_p8 = scmp.ne.s32.totalorder %s41_s20, %s74_s0  ;;  %p80_p10 = scmp.lt.s32.totalorder %s74_s0, %s74_s0 }
  0x16   :  { %vm29_vm0 = vcmp.lt.s32.totalorder %v28_v3, 1 }
  0x17   :  { %25 = vrot.lane.b32.xlu0 %v22_v1, %s101_s18  ;;  %p81_p11 = por %p80_p10, %p79_p9 }
  0x19   :  { %p82_p12 = pnand %p81_p11, %p75_p8 }
  0x85   :  { %v24_v4 = vpop.permute.xlu0 %23 }
  0x89   :  { %v26_v5 = vpop.permute.xlu0 %25 }
  0x8a   :  { %v30_v6 = vsel %vm29_vm0, %v24_v4, %v26_v5  ;;  %v31_v7 = vsel %vm29_vm0, %v26_v5, %v24_v4 }
  0x8b   :  { %32 = vst [vmem:[#allocation5] sm:$0xff] %v31_v7  ;;  %33 = vst [vmem:[#allocation5 + $0x8] sm:$0xff] %v30_v6 }
  0x8c   :  { %85 = shalt.err (!%p82_p12)
}
  0x8d   :  { %s86_s23 = scalar_lea.hbm %s138_s1, 256 }
  0x8e   :  { %p87_p13 = scmp.ne.s32.totalorder %s138_s1, %s86_s23  ;;  %p90_p0 = scmp.lt.u32.totalorder %s86_s23, %s138_s1 }
  0x90   :  { %p92_p1 = pnand %p90_p0, %p87_p13 }
  0x92   :  { %95 = shalt.err (!%p92_p1)
}
  0x93   :  { %43 = dma.vmem_to_hbm [thread:$0]  %s41_s20, 256, %s138_s1, [#allocation4]  }
  0x94   :  { %98 = dma.done.wait [#allocation4], 256  }
  0x95   :  { %99 = vsyncadd [#allocation4], 4294967040 }
  0x96   :  { %47 = vsyncpa [#allocation3], 1 }
  0x97   :  { %48 = vsyncpa [#allocation4], 1 }

</bundles_post_ra>
